<compile_context>
chip_gen: v6e
topology: v6e:2x2x1
jax: 0.10.0
libtpu: 0.0.40
codegen_flags: <defaults>
</compile_context>

<pallas_src>
import jax
import jax.numpy as jnp
from jax.experimental import pallas as pl
from jax.experimental.pallas import tpu as pltpu


def _round_up(x, m):
    return (x + m - 1) // m * m


def _linear_kernel(x_ref, wt_ref, b_ref, o_ref):
    # x_ref: (TB, K) native dtype (streamed), wt_ref: (K, N) bf16 (resident),
    # b_ref: (1, N) f32 (resident), o_ref: (TB, N).
    x = x_ref[...].astype(wt_ref.dtype)  # cast in VMEM, hidden under the input DMA
    acc = jnp.dot(x, wt_ref[...], preferred_element_type=jnp.float32)
    o_ref[...] = (acc + b_ref[...]).astype(o_ref.dtype)


def prepare_params(weight, bias, compute_dtype=jnp.bfloat16):
    """Pack nn.Linear params once (hoisted out of the hot path).

    weight: (N, K) in torch nn.Linear convention; bias: (N,).
    Returns wt_packed (K, N) compute_dtype and bias_packed (1, N) float32.
    """
    n_out = weight.shape[0]
    wt = weight.T.astype(compute_dtype)                       # transpose + cast once
    b = bias.astype(jnp.float32).reshape(1, n_out)
    return wt, b


def attention_pooling3_forward(inputs, wt_packed, bias_packed,
                               *, block_b=2048, out_dtype=None):
    """inputs: (B, emb_num, emb_dim). Returns (B, emb_dim) == torch forward."""
    B = inputs.shape[0]
    x = inputs.reshape(B, -1)                                  # matches torch .view (no copy)
    K = x.shape[1]
    N = wt_packed.shape[1]
    out_dtype = out_dtype or inputs.dtype

    # Batch tile: full-dim block for small B (satisfies the (8,128) rule by
    # matching the array dim); otherwise split into >=2 tiles (16-aligned) so
    # the "parallel" grid axis can feed both v7x TensorCores, capped at block_b.
    if B < 32:
        TB = B
    else:
        TB = min(block_b, _round_up(pl.cdiv(B, 2), 16))
    grid = (pl.cdiv(B, TB),)

    x_itemsize = jnp.dtype(x.dtype).itemsize
    w_itemsize = jnp.dtype(wt_packed.dtype).itemsize
    o_itemsize = jnp.dtype(out_dtype).itemsize

    # Right-sized VMEM limit: double-buffered x + out tiles, resident W + bias,
    # plus headroom; clamped to [8 MiB, 32 MiB] (never the full physical VMEM).
    footprint = (2 * TB * K * x_itemsize
                 + 2 * TB * N * o_itemsize
                 + K * N * w_itemsize
                 + N * 4)
    vmem_limit = min(32 * 1024 * 1024, max(8 * 1024 * 1024, int(footprint * 1.5)))

    cost = pl.CostEstimate(
        flops=2 * B * K * N,
        transcendentals=0,
        bytes_accessed=(B * K * x_itemsize          # x stream (native dtype, no wrapper cast)
                        + K * N * w_itemsize        # resident weight
                        + N * 4                     # bias
                        + B * N * o_itemsize),      # unpadded output write
    )

    out = pl.pallas_call(
        _linear_kernel,
        out_shape=jax.ShapeDtypeStruct((B, N), out_dtype),
        grid_spec=pltpu.PrefetchScalarGridSpec(
            num_scalar_prefetch=0,
            grid=grid,
            in_specs=[
                # pipelined x tiles (double-buffered by default)
                pl.BlockSpec((TB, K), lambda i: (i, 0)),
                # weight / bias: constant index_map -> VMEM-resident, single buffer
                pl.BlockSpec((K, N), lambda i: (0, 0), pipeline_mode=pl.Buffered(1)),
                pl.BlockSpec((1, N), lambda i: (0, 0), pipeline_mode=pl.Buffered(1)),
            ],
            out_specs=pl.BlockSpec((TB, N), lambda i: (i, 0)),
        ),
        compiler_params=pltpu.CompilerParams(
            dimension_semantics=("parallel",),   # batch tiles independent
            vmem_limit_bytes=vmem_limit,
        ),
        cost_estimate=cost,
    )(x, wt_packed, bias_packed)

    return out


def _reference_checks(inputs, weight, bias, out):
    B = inputs.shape[0]
    x_flat = inputs.reshape(B, -1)
    ref_bf16 = (x_flat.astype(jnp.bfloat16).astype(jnp.float32)
                @ weight.T.astype(jnp.bfloat16).astype(jnp.float32)) + bias
    ref_f32 = x_flat @ weight.T + bias
    assert out.shape == (B, weight.shape[0])
    assert jnp.allclose(out, ref_bf16, atol=2e-3, rtol=2e-3), "mismatch vs bf16 ref"
    assert jnp.allclose(out, ref_f32, atol=5e-2, rtol=5e-2), "mismatch vs f32 ref"


if __name__ == "__main__":
    # Small shapes consistent with the module: emb_dim=32, emb_num=8, batch=2.
    B, emb_num, emb_dim = 2, 8, 32
    in_features = emb_dim * emb_num  # 256

    key = jax.random.PRNGKey(0)
    k_in, k_w, k_b, k_in2 = jax.random.split(key, 4)

    inputs = jax.random.normal(k_in, (B, emb_num, emb_dim), dtype=jnp.float32)

    # Deterministic init mimicking nn.Linear's U(-1/sqrt(fan_in), 1/sqrt(fan_in)).
    bound = 1.0 / (in_features ** 0.5)
    weight = jax.random.uniform(k_w, (emb_dim, in_features),
                                minval=-bound, maxval=bound, dtype=jnp.float32)
    bias = jax.random.uniform(k_b, (emb_dim,),
                              minval=-bound, maxval=bound, dtype=jnp.float32)

    # Parameter packing (transpose + bf16 cast) hoisted out of the hot path.
    wt_packed, bias_packed = prepare_params(weight, bias)

    # 1) Tiny single-tile case (B=2).
    out = attention_pooling3_forward(inputs, wt_packed, bias_packed)
    out = jax.block_until_ready(out)
    _reference_checks(inputs, weight, bias, out)

    # 2) Multi-tile + partial-last-tile case (B=35, block_b=16 -> grid=3, last tile 3 rows).
    inputs2 = jax.random.normal(k_in2, (35, emb_num, emb_dim), dtype=jnp.float32)
    out2 = attention_pooling3_forward(inputs2, wt_packed, bias_packed, block_b=16)
    out2 = jax.block_until_ready(out2)
    _reference_checks(inputs2, weight, bias, out2)

    print("KERNEL_OK")
</pallas_src>

<mosaic_0001>
module attributes {stable_mosaic.version = 11 : i64} {
  func.func @_linear_kernel(%arg0: i32, %arg1: memref<2x256xf32, #tpu.memory_space<vmem>>, %arg2: memref<256x32xbf16, #tpu.memory_space<vmem>>, %arg3: memref<1x32xf32, #tpu.memory_space<vmem>>, %arg4: memref<2x32xf32, #tpu.memory_space<vmem>>) attributes {dimension_semantics = [#tpu.dimension_semantics<parallel>], iteration_bounds = array<i64: 1>, scalar_prefetch = 0 : i64, scratch_operands = 0 : i64, tpu.core_type = #tpu.core_type<tc>, window_params = [{transform_indices = @transform_0, window_bounds = array<i64: 2, 256>}, {pipeline_mode = #tpu.pipeline_mode<synchronous>, transform_indices = @transform_1, window_bounds = array<i64: 256, 32>}, {pipeline_mode = #tpu.pipeline_mode<synchronous>, transform_indices = @transform_2, window_bounds = array<i64: 1, 32>}, {transform_indices = @transform_3, window_bounds = array<i64: 2, 32>}]} {
    %c0 = arith.constant 0 : index
    %c0_0 = arith.constant 0 : index
    %0 = vector.load %arg1[%c0, %c0_0] : memref<2x256xf32, #tpu.memory_space<vmem>>, vector<2x256xf32>
    %1 = arith.truncf %0 : vector<2x256xf32> to vector<2x256xbf16>
    %c0_1 = arith.constant 0 : index
    %c0_2 = arith.constant 0 : index
    %2 = vector.load %arg2[%c0_1, %c0_2] : memref<256x32xbf16, #tpu.memory_space<vmem>>, vector<256x32xbf16>
    %cst = arith.constant dense<0.000000e+00> : vector<2x32xf32>
    %3 = tpu.matmul %1, %2, %cst {dimension_numbers = #tpu.dot_dimension_numbers<[1], [0], [0], [1], [0, 0, 1, 1], [], []>} : vector<2x256xbf16>, vector<256x32xbf16>, vector<2x32xf32> -> vector<2x32xf32>
    %c0_3 = arith.constant 0 : index
    %c0_4 = arith.constant 0 : index
    %4 = vector.load %arg3[%c0_3, %c0_4] : memref<1x32xf32, #tpu.memory_space<vmem>>, vector<1x32xf32>
    %5 = vector.broadcast %4 : vector<1x32xf32> to vector<2x32xf32>
    %6 = arith.addf %3, %5 : vector<2x32xf32>
    %c0_5 = arith.constant 0 : index
    %c0_6 = arith.constant 0 : index
    %7 = vector.load %arg4[%c0_5, %c0_6] : memref<2x32xf32, #tpu.memory_space<vmem>>, vector<2x32xf32>
    tpu.vector_store %arg4[%c0_5, %c0_6], %6 {strides = array<i32>} : memref<2x32xf32, #tpu.memory_space<vmem>>, vector<2x32xf32>,
    return
  }
  func.func @transform_0(%arg0: i32) -> (i32, i32) {
    %c0_i32 = arith.constant 0 : i32
    %c0_i32_0 = arith.constant 0 : i32
    return %arg0, %c0_i32 : i32, i32
  }
  func.func @transform_1(%arg0: i32) -> (i32, i32) {
    %c0_i32 = arith.constant 0 : i32
    %c0_i32_0 = arith.constant 0 : i32
    %c0_i32_1 = arith.constant 0 : i32
    return %c0_i32, %c0_i32_0 : i32, i32
  }
  func.func @transform_2(%arg0: i32) -> (i32, i32) {
    %c0_i32 = arith.constant 0 : i32
    %c0_i32_0 = arith.constant 0 : i32
    %c0_i32_1 = arith.constant 0 : i32
    return %c0_i32, %c0_i32_0 : i32, i32
  }
  func.func @transform_3(%arg0: i32) -> (i32, i32) {
    %c0_i32 = arith.constant 0 : i32
    %c0_i32_0 = arith.constant 0 : i32
    return %arg0, %c0_i32 : i32, i32
  }
}

</mosaic_0001>

<bundles_post_ra>
// kernel: tpu_custom_call.1
= control target key start
LH: loop header
LB: loop body
LE: loop exit
PB: predicated region body
PF: predicated region fallthrough
CT: control target
= control target key end

     0   :  { %s378_s0 = inlined_call_operand.vmem [shape: f32[2,256], index: 0, kind: input, shape index: {}]   ;;  %s379_s1 = inlined_call_operand.vmem [shape: bf16[256,32], index: 1, kind: input, shape index: {}]   ;;  %s380_s2 = inlined_call_operand.vmem [shape: f32[1,32], index: 2, kind: input, shape index: {}]   ;;  %s381_s3 = inlined_call_operand.hbm [shape: f32[2,32], index: 3, kind: output, shape index: {}]  }
   0x1   :  { %v262_v0 = vld [vmem:[%s379_s1 + $0x78] sm:$0xff]   ;;  %v264_v2 = vld [vmem:[%s379_s1 + $0x70] sm:$0xff]   ;;  %v266_v4 = vld [vmem:[%s379_s1 + $0x68] sm:$0xff]  }
   0x2   :  { %v263_v1 = vld [vmem:[%s379_s1 + $0x38] sm:$0xff]   ;;  %239 = vmatprep.subr.bf16.mxu0 %v262_v0  ;;  %v265_v3 = vld [vmem:[%s379_s1 + $0x30] sm:$0xff]   ;;  %v267_v5 = vld [vmem:[%s379_s1 + $0x28] sm:$0xff]  }
   0x3   :  { %240 = vmatpush3.bf16.msra.mxu0 %v263_v1  ;;  %v268_v6 = vld [vmem:[%s379_s1 + $0x60] sm:$0xff]   ;;  %v270_v8 = vld [vmem:[%s379_s1 + $0x58] sm:$0xff]   ;;  %v272_v10 = vld [vmem:[%s379_s1 + $0x50] sm:$0xff]  }
   0x4   :  { %241 = vmatprep.subr.bf16.mxu0 %v264_v2  ;;  %v269_v7 = vld [vmem:[%s379_s1 + $0x20] sm:$0xff]   ;;  %v271_v9 = vld [vmem:[%s379_s1 + $0x18] sm:$0xff]  }
   0x5   :  { %v221_v11 = vld.sshfl [vmem:[%s378_s0] sm:$0x33 pattern:$0x76325410] }
   0x7   :  { %242 = vmatpush3.bf16.msra.mxu0 %v265_v3 }
   0x8   :  { %243 = vmatprep.subr.bf16.mxu0 %v266_v4 }
   0xb   :  { %244 = vmatpush3.bf16.msra.mxu0 %v267_v5 }
   0xc   :  { %245 = vmatprep.subr.bf16.mxu0 %v268_v6 }
   0xf   :  { %246 = vmatpush3.bf16.msra.mxu0 %v269_v7 }
  0x10   :  { %247 = vmatprep.subr.bf16.mxu0 %v270_v8 }
  0x11   :  { %8 = vsyncpa [#allocation3], 0  ;;  %v25_v12 = vcombine.high %v221_v11, %v221_v11  ;;  %v273_v13 = vld [vmem:[%s379_s1 + $0x10] sm:$0xff]   ;;  %v274_v15 = vld [vmem:[%s379_s1 + $0x48] sm:$0xff]   ;;  %v28_v19 = vpack.c.bf16 %v221_v11, %v221_v11  ;;  %s300_s20 = smov [#allocation2]   ;;  %vm205_vm0 = vcmask 254976  }
  0x12   :  { %v275_v16 = vld [vmem:[%s379_s1 + $0x8] sm:$0xff]   ;;  %v276_v17 = vld [vmem:[%s379_s1 + $0x40] sm:$0xff]   ;;  %s213_s21 = sshll.u32 %s300_s20, 4  ;;  %s214_s21 = int_to_ptr.vmem [resolvable:$true] %s213_s21 }
  0x13   :  { %248 = vmatpush3.bf16.msra.mxu0 %v271_v9  ;;  %v29_v14 = vpack.c.bf16 %v25_v12, %v25_v12  ;;  %v277_v18 = vld [vmem:[%s379_s1] sm:$0xff]   ;;  %s278_s1 = scalar_lea.vmem %s214_s21, 32  ;;  %p283_p1 = scmp.lt.s32.totalorder %s214_s21, %s214_s21 }
  0x14   :  { %249 = vmatprep.subr.bf16.mxu0 %v272_v10  ;;  %v222_v21 = vld [vmem:[%s380_s2] ss:$0 sm:$0xff]  ;;  %p279_p0 = scmp.ne.s32.totalorder %s214_s21, %s278_s1  ;;  %p284_p2 = scmp.lt.s32.totalorder %s278_s1, %s278_s1 }
  0x15   :  { %197 = vmatprep.mubr.bf16.mxu0 %v29_v14 }
  0x16   :  { %p285_p3 = por %p284_p2, %p283_p1 }
  0x17   :  { %250 = vmatpush3.bf16.msra.mxu0 %v273_v13 }
  0x18   :  { %251 = vmatprep.subr.bf16.mxu0 %v274_v15  ;;  %p286_p4 = pnand %p285_p3, %p279_p0 }
  0x1b   :  { %252 = vmatpush3.bf16.msra.mxu0 %v275_v16 }
  0x1c   :  { %253 = vmatprep.subr.bf16.mxu0 %v276_v17 }
  0x1f   :  { %254 = vmatpush3.bf16.msra.mxu0 %v277_v18 }
  0x22   :  { %198 = vmatmul.mubr.bf16.vlgmr.msra.gmra.mxu0 %v28_v19 }
  0xe2   :  { %v255_v20 = vpop.f32.mrf.mxu0 }
  0xe4   :  { %v256_v22 = vpop.f32.mrf.mxu0 }
  0xe5   :  { %v257_v23 = vadd.f32 %v256_v22, %v255_v20 }
  0xe6   :  { %v258_v24 = vpop.f32.mrf.mxu0 }
  0xe7   :  { %v200_v25 = vadd.f32 %v257_v23, %v222_v21 }
  0xe8   :  { %v259_v26 = vpop.f32.mrf.mxu0 }
  0xe9   :  { %206 = vst.msk [vmem:[#allocation2] sm:$0x3] %vm205_vm0, %v200_v25 }
  0xea   :  { %289 = shalt.err (!%p286_p4)
}
  0xeb   :  { %216 = dma.vmem_to_hbm [thread:$0]  %s214_s21, 32, %s381_s3, [#allocation3]  }
  0xec   :  { %298 = dma.done.wait [#allocation3], 32  }
  0xed   :  { %299 = vsyncadd [#allocation3], 4294967264 }
  0xee   :  { %220 = vsyncpa [#allocation3], 1 }

</bundles_post_ra>
